<compile_context>
chip_gen: v5e
topology: v5e:2x2
jax: 0.10.0
libtpu: 0.0.40
codegen_flags: <defaults>
</compile_context>

<pallas_src>
import jax
import jax.numpy as jnp
from jax.experimental import pallas as pl
from jax.experimental.pallas import tpu as pltpu


def _round_up(x, m):
    return ((x + m - 1) // m) * m


def _pick_tile(padded, cap, align):
    """Largest multiple of `align`, <= min(cap, padded), that exactly divides `padded`."""
    t = max(align, (min(cap, padded) // align) * align)
    while padded % t != 0:
        t -= align
    return t


def _linear_add_relu_kernel(other_ref, x_ref, wt_ref, o_ref):
    """One (tm, tn) output tile.  Whole padded K is resident in VMEM, so there is no
    reduction grid axis and no accumulator scratch: one MXU pass + fused epilogue.

    other_ref: (1,)       f32 SMEM scalar (the additive `other` term)
    x_ref:     (tm, Kp)   VMEM tile of x
    wt_ref:    (Kp, tn)   VMEM tile of W^T (pre-transposed once in the wrapper)
    o_ref:     (tm, tn)   VMEM output tile
    """
    acc = jnp.dot(x_ref[...], wt_ref[...], preferred_element_type=jnp.float32)
    o_ref[...] = jnp.maximum(acc + other_ref[0], 0.0).astype(o_ref.dtype)


def linear_add_relu(x, weight, other=0.0, *, tm_cap=512, tn_cap=256):
    """Pallas equivalent of Model.forward: relu(x @ W^T + other).

    x:      (B, IN)
    weight: (OUT, IN)   -- torch.nn.Linear layout, bias-free
    other:  python/JAX scalar (the module's default is 0)
    """
    B, IN = x.shape
    OUT, IN_w = weight.shape
    assert IN == IN_w, (IN, IN_w)

    itemsize = jnp.dtype(x.dtype).itemsize
    sub = {4: 8, 2: 16, 1: 32}.get(itemsize, 8)  # dtype-aware sublane alignment

    # Minimal alignment first (NOT tile multiples) so no extra rows/cols are padded in.
    Mp = _round_up(max(B, 1), sub)
    Np = _round_up(max(OUT, 1), 128)
    Kp = _round_up(max(IN, 1), 128)

    # Tiles that exactly divide the padded dims.
    tm = _pick_tile(Mp, tm_cap, sub)
    tn = _pick_tile(Np, tn_cap, 128)
    # v7x has 2 TensorCores: make sure the parallel grid has >= 2 points when possible.
    if (Mp // tm) * (Np // tn) < 2:
        if Np // 128 >= 2:
            tn = _pick_tile(Np, Np // 2, 128)
        elif Mp // sub >= 2:
            tm = _pick_tile(Mp, Mp // 2, sub)

    # TODO(synk): for huge IN (Kp tiles no longer fitting VMEM) a K grid axis + f32
    # accumulator would be needed; irrelevant for Linear(3 -> 8).
    # TODO(synk): tensor-valued `other` (broadcast add) not supported; scalar only,
    # matching the module's default `other=0`.

    # Zero padding: zeros along K contribute nothing; padded rows/cols sliced off below.
    x_p = jnp.pad(x, ((0, Mp - B), (0, Kp - IN)))
    # Pre-transpose once in the wrapper -> kernel feeds the MXU a plain (tm,K)x(K,tn).
    wt_p = jnp.pad(weight.T, ((0, Kp - IN), (0, Np - OUT)))
    other_arr = jnp.asarray(other, dtype=jnp.float32).reshape((1,))

    grid = (Mp // tm, Np // tn)

    # VMEM budget: double-buffered x tile, W^T tile and output tile (no scratch).
    vmem_needed = 2 * (tm * Kp + Kp * tn + tm * tn) * itemsize
    vmem_limit = int(min(max(2 * vmem_needed, 16 * 2 ** 20), 40 * 2 ** 20))  # v7x headroom

    out_p = pl.pallas_call(
        _linear_add_relu_kernel,
        out_shape=jax.ShapeDtypeStruct((Mp, Np), x.dtype),
        grid_spec=pltpu.PrefetchScalarGridSpec(
            num_scalar_prefetch=0,
            grid=grid,
            in_specs=[
                pl.BlockSpec(memory_space=pltpu.MemorySpace.SMEM),   # `other` scalar
                pl.BlockSpec((tm, Kp), lambda i, j: (i, 0)),         # x tile (full K)
                pl.BlockSpec((Kp, tn), lambda i, j: (0, j)),         # W^T tile (full K)
            ],
            out_specs=pl.BlockSpec((tm, tn), lambda i, j: (i, j)),
        ),
        compiler_params=pltpu.CompilerParams(
            dimension_semantics=("parallel", "parallel"),
            vmem_limit_bytes=vmem_limit,
        ),
    )(other_arr, x_p, wt_p)

    return out_p[:B, :OUT]


if __name__ == "__main__":
    key = jax.random.PRNGKey(0)
    kx, kw, kx2, kw2 = jax.random.split(key, 4)

    # --- Shapes implied by the module: x (1, 3), Linear(3 -> 8, bias=False) ---
    x = jax.random.normal(kx, (1, 3), dtype=jnp.float32)
    bound = 1.0 / jnp.sqrt(3.0)  # torch kaiming-uniform range for in_features=3
    weight = jax.random.uniform(kw, (8, 3), dtype=jnp.float32, minval=-bound, maxval=bound)

    out = linear_add_relu(x, weight, other=0.0)
    jax.block_until_ready(out)
    ref = jnp.maximum(x @ weight.T + 0.0, 0.0)
    assert out.shape == (1, 8)
    assert jnp.allclose(out, ref, atol=1e-4), "mismatch vs reference (module shapes)"

    # --- Larger check exercising a multi-tile (M, N) grid with non-tile-multiple dims ---
    B2, IN2, OUT2 = 272, 300, 384
    x2 = jax.random.normal(kx2, (B2, IN2), dtype=jnp.float32)
    w2 = jax.random.normal(kw2, (OUT2, IN2), dtype=jnp.float32) * 0.05
    other2 = 0.5
    out2 = linear_add_relu(x2, w2, other=other2)
    jax.block_until_ready(out2)
    ref2 = jnp.maximum(x2 @ w2.T + other2, 0.0)
    assert out2.shape == (B2, OUT2)
    assert jnp.allclose(out2, ref2, atol=1e-3, rtol=1e-3), "mismatch vs reference (tiled shapes)"

    print("KERNEL_OK")
</pallas_src>

<mosaic_0001>
module attributes {stable_mosaic.version = 11 : i64} {
  func.func @_linear_add_relu_kernel(%arg0: i32, %arg1: i32, %arg2: memref<1xf32, #tpu.memory_space<smem>>, %arg3: memref<8x128xf32, #tpu.memory_space<vmem>>, %arg4: memref<128x128xf32, #tpu.memory_space<vmem>>, %arg5: memref<8x128xf32, #tpu.memory_space<vmem>>) attributes {dimension_semantics = [#tpu.dimension_semantics<parallel>, #tpu.dimension_semantics<parallel>], iteration_bounds = array<i64: 1, 1>, scalar_prefetch = 0 : i64, scratch_operands = 0 : i64, tpu.core_type = #tpu.core_type<tc>, window_params = [{transform_indices = @transform_0, window_bounds = array<i64: 1>}, {transform_indices = @transform_1, window_bounds = array<i64: 8, 128>}, {transform_indices = @transform_2, window_bounds = array<i64: 128, 128>}, {transform_indices = @transform_3, window_bounds = array<i64: 8, 128>}]} {
    %c0 = arith.constant 0 : index
    %c0_0 = arith.constant 0 : index
    %0 = vector.load %arg3[%c0, %c0_0] : memref<8x128xf32, #tpu.memory_space<vmem>>, vector<8x128xf32>
    %c0_1 = arith.constant 0 : index
    %c0_2 = arith.constant 0 : index
    %1 = vector.load %arg4[%c0_1, %c0_2] : memref<128x128xf32, #tpu.memory_space<vmem>>, vector<128x128xf32>
    %cst = arith.constant dense<0.000000e+00> : vector<8x128xf32>
    %2 = tpu.matmul %0, %1, %cst {dimension_numbers = #tpu.dot_dimension_numbers<[1], [0], [0], [1], [0, 0, 1, 1], [], []>} : vector<8x128xf32>, vector<128x128xf32>, vector<8x128xf32> -> vector<8x128xf32>
    %c0_3 = arith.constant 0 : index
    %3 = memref.load %arg2[%c0_3] : memref<1xf32, #tpu.memory_space<smem>>
    %4 = vector.broadcast %3 : f32 to vector<8x128xf32>
    %5 = arith.addf %2, %4 : vector<8x128xf32>
    %cst_4 = arith.constant 0.000000e+00 : f32
    %6 = vector.broadcast %cst_4 : f32 to vector<8x128xf32>
    %7 = arith.maximumf %5, %6 : vector<8x128xf32>
    %c0_5 = arith.constant 0 : index
    %c0_6 = arith.constant 0 : index
    %8 = vector.load %arg5[%c0_5, %c0_6] : memref<8x128xf32, #tpu.memory_space<vmem>>, vector<8x128xf32>
    tpu.vector_store %arg5[%c0_5, %c0_6], %7 {strides = array<i32>} : memref<8x128xf32, #tpu.memory_space<vmem>>, vector<8x128xf32>,
    return
  }
  func.func @transform_0(%arg0: i32, %arg1: i32) -> i32 {
    %c0_i32 = arith.constant 0 : i32
    %c0_i32_0 = arith.constant 0 : i32
    return %c0_i32 : i32
  }
  func.func @transform_1(%arg0: i32, %arg1: i32) -> (i32, i32) {
    %c0_i32 = arith.constant 0 : i32
    %c0_i32_0 = arith.constant 0 : i32
    return %arg0, %c0_i32 : i32, i32
  }
  func.func @transform_2(%arg0: i32, %arg1: i32) -> (i32, i32) {
    %c0_i32 = arith.constant 0 : i32
    %c0_i32_0 = arith.constant 0 : i32
    return %c0_i32, %arg1 : i32, i32
  }
  func.func @transform_3(%arg0: i32, %arg1: i32) -> (i32, i32) {
    %c0_i32 = arith.constant 0 : i32
    return %arg0, %arg1 : i32, i32
  }
}

</mosaic_0001>

<bundles_post_ra>
// kernel: tpu_custom_call.1
= control target key start
LH: loop header
LB: loop body
LE: loop exit
PB: predicated region body
PF: predicated region fallthrough
CT: control target
= control target key end

     0   :  { %9 = vsyncpa [#allocation4], 0  ;;  %s225_s0 = inlined_call_operand.<no memory space> [shape: f32[1], index: 0, kind: input, shape index: {}]   ;;  %s226_s1 = inlined_call_operand.hbm [shape: f32[8,128], index: 1, kind: input, shape index: {}]   ;;  %s227_s2 = inlined_call_operand.hbm [shape: f32[128,128], index: 2, kind: input, shape index: {}]   ;;  %s228_s3 = inlined_call_operand.hbm [shape: f32[8,128], index: 3, kind: output, shape index: {}]  }
   0x1   :  { %10 = vsyncpa [#allocation7], 0 }
   0x2   :  { %11 = vsyncpa [#allocation5], 0  ;;  %s19_s14 = sshll.u32 %s226_s1, 4  ;;  %s188_s15 = smov [#allocation3]   ;;  %s20_s14 = int_to_ptr.hbm [resolvable:$true] %s19_s14 }
   0x3   :  { %s21_s16 = sshll.u32 %s188_s15, 4  ;;  %s29_s19 = sshll.u32 %s227_s2, 4  ;;  %s22_s16 = int_to_ptr.vmem [resolvable:$true] %s21_s16  ;;  %s30_s19 = int_to_ptr.hbm [resolvable:$true] %s29_s19 }
   0x4   :  { %24 = dma.hbm_to_vmem [thread:$0]  %s20_s14, 128, %s22_s16, [#allocation4]  }
   0x5   :  { %s189_s20 = smov [#allocation6]   ;;  %s190_s22 = smov 128  }
   0x6   :  { %s31_s21 = sshll.u32 %s189_s20, 4  ;;  %s191_s23 = smov 8   ;;  %s32_s21 = int_to_ptr.vmem [resolvable:$true] %s31_s21 }
   0x7   :  { %37 = dma.hbm_to_vmem [thread:$0]  %s30_s19, 2048, %s32_s21, [#allocation7], %s190_s22, %s190_s22, %s191_s23  }
   0x8   :  { %182 = dma.done.wait [#allocation4], 128  }
   0x9   :  { %183 = vsyncadd [#allocation4], 4294967168 }
   0xa   :  { %184 = dma.done.wait [#allocation7], 2048  }
   0xb   :  { %185 = vsyncadd [#allocation7], 4294965248  ;;  %v62_v0 = vld [vmem:[#allocation6 + $0x78] sm:$0xff]  ;;  %v61_v1 = vld [vmem:[#allocation6 + $0x70] sm:$0xff]  ;;  %v64_v17 = vstv %s225_s0  ;;  %s192_s24 = smov [#allocation8]   ;;  %s94_s28 = sshll.u32 %s228_s3, 4  ;;  %s95_s28 = int_to_ptr.hbm [resolvable:$true] %s94_s28 }
   0xc   :  { %65 = vmatpush.msra.mxu0 %v62_v0  ;;  %v60_v2 = vld [vmem:[#allocation6 + $0x68] sm:$0xff]  ;;  %v59_v3 = vld [vmem:[#allocation6 + $0x60] sm:$0xff]  ;;  %v58_v4 = vld [vmem:[#allocation6 + $0x58] sm:$0xff]  ;;  %s92_s25 = sshll.u32 %s192_s24, 4  ;;  %s93_s25 = int_to_ptr.vmem [resolvable:$true] %s92_s25 }
   0xd   :  { %v57_v5 = vld [vmem:[#allocation6 + $0x50] sm:$0xff]  ;;  %v56_v6 = vld [vmem:[#allocation6 + $0x48] sm:$0xff]  ;;  %v55_v7 = vld [vmem:[#allocation6 + $0x40] sm:$0xff] }
   0xe   :  { %66 = vmatpush.msra.mxu0 %v61_v1  ;;  %v54_v8 = vld [vmem:[#allocation6 + $0x38] sm:$0xff]  ;;  %v53_v9 = vld [vmem:[#allocation6 + $0x30] sm:$0xff]  ;;  %v52_v10 = vld [vmem:[#allocation6 + $0x28] sm:$0xff] }
   0xf   :  { %v51_v11 = vld [vmem:[#allocation6 + $0x20] sm:$0xff]  ;;  %v50_v12 = vld [vmem:[#allocation6 + $0x18] sm:$0xff]  ;;  %v49_v13 = vld [vmem:[#allocation6 + $0x10] sm:$0xff] }
  0x10   :  { %67 = vmatpush.msra.mxu0 %v60_v2  ;;  %v48_v14 = vld [vmem:[#allocation6 + $0x8] sm:$0xff]  ;;  %v47_v15 = vld [vmem:[#allocation6] sm:$0xff]  ;;  %v46_v16 = vld [vmem:[#allocation3] sm:$0xff] }
  0x12   :  { %68 = vmatpush.msra.mxu0 %v59_v3 }
  0x14   :  { %69 = vmatpush.msra.mxu0 %v58_v4 }
  0x16   :  { %70 = vmatpush.msra.mxu0 %v57_v5 }
  0x18   :  { %71 = vmatpush.msra.mxu0 %v56_v6 }
  0x1a   :  { %72 = vmatpush.msra.mxu0 %v55_v7 }
  0x1c   :  { %73 = vmatpush.msra.mxu0 %v54_v8 }
  0x1e   :  { %74 = vmatpush.msra.mxu0 %v53_v9 }
  0x20   :  { %75 = vmatpush.msra.mxu0 %v52_v10 }
  0x22   :  { %76 = vmatpush.msra.mxu0 %v51_v11 }
  0x24   :  { %77 = vmatpush.msra.mxu0 %v50_v12 }
  0x26   :  { %78 = vmatpush.msra.mxu0 %v49_v13 }
  0x28   :  { %79 = vmatpush.msra.mxu0 %v48_v14 }
  0x2a   :  { %80 = vmatpush.msra.mxu0 %v47_v15 }
  0x2b   :  { %81 = vmatmul.f32.vlgmr.msra.gmra.mxu0 %v46_v16 }
  0xa8   :  { %v82_v18 = vpop.f32.mrf.mxu0 }
  0xa9   :  { %v83_v19 = vadd.f32 %v82_v18, %v64_v17 }
  0xab   :  { %v85_v20 = vmax.f32 %v83_v19, 0.0 }
  0xad   :  { %86 = vst [vmem:[#allocation8] sm:$0xff] %v85_v20 }
  0xae   :  { %97 = dma.vmem_to_hbm [thread:$0]  %s93_s25, 128, %s95_s28, [#allocation5]  }
  0xaf   :  { %186 = dma.done.wait [#allocation5], 128  }
  0xb0   :  { %187 = vsyncadd [#allocation5], 4294967168 }
  0xb1   :  { %102 = vsyncpa [#allocation4], 1 }
  0xb2   :  { %103 = vsyncpa [#allocation7], 1 }
  0xb3   :  { %104 = vsyncpa [#allocation5], 1 }

</bundles_post_ra>
